<compile_context>
chip_gen: v6e
topology: v6e:2x2x1
jax: 0.10.0
libtpu: 0.0.40
codegen_flags: <defaults>
</compile_context>

<pallas_src>
import jax
import jax.numpy as jnp
from jax.experimental import pallas as pl
from jax.experimental.pallas import tpu as pltpu

D_IN = 512
D_HID = 512
D_OUT = 512


def mlp_kernel(x_ref, w1_ref, b1_ref, w2_ref, b2_ref, o_ref):
    # x_ref:  (TB, D_IN)      bf16 VMEM (batch tile)
    # w1_ref: (D_IN, D_HID)   bf16 VMEM (resident, single-buffered)
    # b1_ref: (1, D_HID)      f32  VMEM (resident)
    # w2_ref: (D_HID, D_OUT)  bf16 VMEM (resident, single-buffered)
    # b2_ref: (1, D_OUT)      f32  VMEM (resident)
    # o_ref:  (TB, D_OUT)     f32  VMEM
    x = x_ref[...]

    # First linear: bf16 MXU matmul with f32 accumulation; bias + ReLU in f32.
    h = jnp.dot(x, w1_ref[...], preferred_element_type=jnp.float32)
    h = jnp.maximum(h + b1_ref[...], 0.0)

    # Second linear: keep the intermediate in bf16 (halves VMEM/vreg traffic).
    y = jnp.dot(h.astype(w2_ref.dtype), w2_ref[...],
                preferred_element_type=jnp.float32)
    o_ref[...] = (y + b2_ref[...]).astype(o_ref.dtype)


def mlp_forward(x, w1, b1, w2, b2, *, block_b=256):
    """x: (B, 512). Weights (in, out)-transposed. Returns f32 (B, 512)."""
    B = x.shape[0]

    # Fixed batch tile (<=256), rounded to the sublane multiple of 8.
    tb = min(block_b, B)
    tb = ((tb + 7) // 8) * 8
    b_pad = pl.cdiv(B, tb) * tb

    # bf16 operands on the MXU; biases stay f32.  (In production, store the
    # weights as bf16 in HBM so this cast disappears.)
    x_in = x.astype(jnp.bfloat16)
    if b_pad != B:
        x_in = jnp.pad(x_in, ((0, b_pad - B), (0, 0)))
    w1b = w1.astype(jnp.bfloat16)
    w2b = w2.astype(jnp.bfloat16)
    b1f = b1.astype(jnp.float32).reshape(1, D_HID)
    b2f = b2.astype(jnp.float32).reshape(1, D_OUT)

    grid = (b_pad // tb,)

    # Resident operands never change block index -> single-buffer them.
    resident = dict(pipeline_mode=pl.Buffered(1))

    cost = pl.CostEstimate(
        flops=4 * b_pad * D_IN * D_HID,  # two 512x512 matmuls per row
        transcendentals=0,
        bytes_accessed=(x_in.size * 2            # bf16 activations in
                        + w1b.size * 2 + w2b.size * 2  # bf16 weights
                        + b1f.size * 4 + b2f.size * 4  # f32 biases
                        + b_pad * D_OUT * 4),          # f32 output
    )

    out = pl.pallas_call(
        mlp_kernel,
        out_shape=jax.ShapeDtypeStruct((b_pad, D_OUT), jnp.float32),
        grid_spec=pltpu.PrefetchScalarGridSpec(
            num_scalar_prefetch=0,
            grid=grid,
            in_specs=[
                pl.BlockSpec((tb, D_IN), lambda i: (i, 0)),                  # x tile
                pl.BlockSpec((D_IN, D_HID), lambda i: (0, 0), **resident),   # W1
                pl.BlockSpec((1, D_HID), lambda i: (0, 0), **resident),      # b1
                pl.BlockSpec((D_HID, D_OUT), lambda i: (0, 0), **resident),  # W2
                pl.BlockSpec((1, D_OUT), lambda i: (0, 0), **resident),      # b2
            ],
            out_specs=pl.BlockSpec((tb, D_OUT), lambda i: (i, 0)),
        ),
        compiler_params=pltpu.CompilerParams(
            dimension_semantics=("parallel",),
            vmem_limit_bytes=64 * 1024 * 1024,
        ),
        cost_estimate=cost,
    )(x_in, w1b, b1f, w2b, b2f)

    return out[:B] if b_pad != B else out


def init_params(key):
    """Deterministic init mirroring nn.Linear's uniform(-1/sqrt(in), 1/sqrt(in))."""
    k1, k2, k3, k4 = jax.random.split(key, 4)
    bound1 = 1.0 / jnp.sqrt(jnp.float32(D_IN))
    bound2 = 1.0 / jnp.sqrt(jnp.float32(D_HID))
    # Stored as (in, out) — transposed relative to PyTorch's (out, in).
    w1 = jax.random.uniform(k1, (D_IN, D_HID), jnp.float32, -bound1, bound1)
    b1 = jax.random.uniform(k2, (D_HID,), jnp.float32, -bound1, bound1)
    w2 = jax.random.uniform(k3, (D_HID, D_OUT), jnp.float32, -bound2, bound2)
    b2 = jax.random.uniform(k4, (D_OUT,), jnp.float32, -bound2, bound2)
    return w1, b1, w2, b2


def reference_forward(x, w1, b1, w2, b2):
    """Plain-JAX reference using the same bf16 operand quantization as the kernel."""
    xb = x.astype(jnp.bfloat16)
    w1b = w1.astype(jnp.bfloat16)
    w2b = w2.astype(jnp.bfloat16)
    h = jnp.dot(xb, w1b, preferred_element_type=jnp.float32) + b1.reshape(1, -1)
    h = jnp.maximum(h, 0.0)
    y = jnp.dot(h.astype(jnp.bfloat16), w2b,
                preferred_element_type=jnp.float32) + b2.reshape(1, -1)
    return y


if __name__ == "__main__":
    key = jax.random.PRNGKey(0)
    kx, kp = jax.random.split(key)

    B = 8  # small batch for the sanity run
    x = jax.random.normal(kx, (B, D_IN), jnp.float32)
    w1, b1, w2, b2 = init_params(kp)

    out = jax.block_until_ready(mlp_forward(x, w1, b1, w2, b2))

    ref = reference_forward(x, w1, b1, w2, b2)
    assert out.shape == (B, D_OUT)
    assert out.dtype == jnp.float32
    assert jnp.allclose(out, ref, atol=2e-2, rtol=2e-2), float(
        jnp.max(jnp.abs(out - ref)))

    print("KERNEL_OK")
</pallas_src>

<mosaic_0001>
module attributes {stable_mosaic.version = 11 : i64} {
  func.func @mlp_kernel(%arg0: i32, %arg1: memref<8x512xbf16, #tpu.memory_space<vmem>>, %arg2: memref<512x512xbf16, #tpu.memory_space<vmem>>, %arg3: memref<1x512xf32, #tpu.memory_space<vmem>>, %arg4: memref<512x512xbf16, #tpu.memory_space<vmem>>, %arg5: memref<1x512xf32, #tpu.memory_space<vmem>>, %arg6: memref<8x512xf32, #tpu.memory_space<vmem>>) attributes {dimension_semantics = [#tpu.dimension_semantics<parallel>], iteration_bounds = array<i64: 1>, scalar_prefetch = 0 : i64, scratch_operands = 0 : i64, tpu.core_type = #tpu.core_type<tc>, window_params = [{transform_indices = @transform_0, window_bounds = array<i64: 8, 512>}, {pipeline_mode = #tpu.pipeline_mode<synchronous>, transform_indices = @transform_1, window_bounds = array<i64: 512, 512>}, {pipeline_mode = #tpu.pipeline_mode<synchronous>, transform_indices = @transform_2, window_bounds = array<i64: 1, 512>}, {pipeline_mode = #tpu.pipeline_mode<synchronous>, transform_indices = @transform_3, window_bounds = array<i64: 512, 512>}, {pipeline_mode = #tpu.pipeline_mode<synchronous>, transform_indices = @transform_4, window_bounds = array<i64: 1, 512>}, {transform_indices = @transform_5, window_bounds = array<i64: 8, 512>}]} {
    %c0 = arith.constant 0 : index
    %c0_0 = arith.constant 0 : index
    %0 = vector.load %arg1[%c0, %c0_0] : memref<8x512xbf16, #tpu.memory_space<vmem>>, vector<8x512xbf16>
    %c0_1 = arith.constant 0 : index
    %c0_2 = arith.constant 0 : index
    %1 = vector.load %arg2[%c0_1, %c0_2] : memref<512x512xbf16, #tpu.memory_space<vmem>>, vector<512x512xbf16>
    %cst = arith.constant dense<0.000000e+00> : vector<8x512xf32>
    %2 = tpu.matmul %0, %1, %cst {dimension_numbers = #tpu.dot_dimension_numbers<[1], [0], [0], [1], [0, 0, 1, 1], [], []>} : vector<8x512xbf16>, vector<512x512xbf16>, vector<8x512xf32> -> vector<8x512xf32>
    %c0_3 = arith.constant 0 : index
    %c0_4 = arith.constant 0 : index
    %3 = vector.load %arg3[%c0_3, %c0_4] : memref<1x512xf32, #tpu.memory_space<vmem>>, vector<1x512xf32>
    %4 = vector.broadcast %3 : vector<1x512xf32> to vector<8x512xf32>
    %5 = arith.addf %2, %4 : vector<8x512xf32>
    %cst_5 = arith.constant 0.000000e+00 : f32
    %6 = vector.broadcast %cst_5 : f32 to vector<8x512xf32>
    %7 = arith.maximumf %5, %6 : vector<8x512xf32>
    %8 = arith.truncf %7 : vector<8x512xf32> to vector<8x512xbf16>
    %c0_6 = arith.constant 0 : index
    %c0_7 = arith.constant 0 : index
    %9 = vector.load %arg4[%c0_6, %c0_7] : memref<512x512xbf16, #tpu.memory_space<vmem>>, vector<512x512xbf16>
    %cst_8 = arith.constant dense<0.000000e+00> : vector<8x512xf32>
    %10 = tpu.matmul %8, %9, %cst_8 {dimension_numbers = #tpu.dot_dimension_numbers<[1], [0], [0], [1], [0, 0, 1, 1], [], []>} : vector<8x512xbf16>, vector<512x512xbf16>, vector<8x512xf32> -> vector<8x512xf32>
    %c0_9 = arith.constant 0 : index
    %c0_10 = arith.constant 0 : index
    %11 = vector.load %arg5[%c0_9, %c0_10] : memref<1x512xf32, #tpu.memory_space<vmem>>, vector<1x512xf32>
    %12 = vector.broadcast %11 : vector<1x512xf32> to vector<8x512xf32>
    %13 = arith.addf %10, %12 : vector<8x512xf32>
    %c0_11 = arith.constant 0 : index
    %c0_12 = arith.constant 0 : index
    %14 = vector.load %arg6[%c0_11, %c0_12] : memref<8x512xf32, #tpu.memory_space<vmem>>, vector<8x512xf32>
    tpu.vector_store %arg6[%c0_11, %c0_12], %13 {strides = array<i32>} : memref<8x512xf32, #tpu.memory_space<vmem>>, vector<8x512xf32>,
    return
  }
  func.func @transform_0(%arg0: i32) -> (i32, i32) {
    %c0_i32 = arith.constant 0 : i32
    %c0_i32_0 = arith.constant 0 : i32
    return %arg0, %c0_i32 : i32, i32
  }
  func.func @transform_1(%arg0: i32) -> (i32, i32) {
    %c0_i32 = arith.constant 0 : i32
    %c0_i32_0 = arith.constant 0 : i32
    %c0_i32_1 = arith.constant 0 : i32
    return %c0_i32, %c0_i32_0 : i32, i32
  }
  func.func @transform_2(%arg0: i32) -> (i32, i32) {
    %c0_i32 = arith.constant 0 : i32
    %c0_i32_0 = arith.constant 0 : i32
    %c0_i32_1 = arith.constant 0 : i32
    return %c0_i32, %c0_i32_0 : i32, i32
  }
  func.func @transform_3(%arg0: i32) -> (i32, i32) {
    %c0_i32 = arith.constant 0 : i32
    %c0_i32_0 = arith.constant 0 : i32
    %c0_i32_1 = arith.constant 0 : i32
    return %c0_i32, %c0_i32_0 : i32, i32
  }
  func.func @transform_4(%arg0: i32) -> (i32, i32) {
    %c0_i32 = arith.constant 0 : i32
    %c0_i32_0 = arith.constant 0 : i32
    %c0_i32_1 = arith.constant 0 : i32
    return %c0_i32, %c0_i32_0 : i32, i32
  }
  func.func @transform_5(%arg0: i32) -> (i32, i32) {
    %c0_i32 = arith.constant 0 : i32
    %c0_i32_0 = arith.constant 0 : i32
    return %arg0, %c0_i32 : i32, i32
  }
}

</mosaic_0001>

<bundles_post_ra>
// kernel: tpu_custom_call.1
= control target key start
LH: loop header
LB: loop body
LE: loop exit
PB: predicated region body
PF: predicated region fallthrough
CT: control target
= control target key end

     0   :  { %10 = vsyncpa [#allocation3], 0  ;;  %s2897_s0 = inlined_call_operand.hbm [shape: bf16[8,512], index: 0, kind: input, shape index: {}]   ;;  %s2898_s1 = inlined_call_operand.hbm [shape: bf16[512,512], index: 1, kind: input, shape index: {}]   ;;  %s2899_s2 = inlined_call_operand.hbm [shape: f32[1,512], index: 2, kind: input, shape index: {}]   ;;  %s2900_s3 = inlined_call_operand.hbm [shape: bf16[512,512], index: 3, kind: input, shape index: {}]   ;;  %s2901_s4 = inlined_call_operand.vmem [shape: f32[1,512], index: 4, kind: input, shape index: {}]   ;;  %s2902_s5 = inlined_call_operand.hbm [shape: f32[8,512], index: 5, kind: output, shape index: {}]  }
   0x1   :  { %11 = vsyncpa [#allocation6], 0 }
   0x2   :  { %12 = vsyncpa [#allocation9], 0 }
   0x3   :  { %13 = vsyncpa [#allocation4], 0  ;;  %s2788_s18 = smov [#allocation5]  }
   0x4   :  { %s29_s19 = sshll.u32 %s2788_s18, 4  ;;  %s30_s19 = int_to_ptr.vmem [resolvable:$true] %s29_s19 }
   0x5   :  { %s2688_s20 = scalar_lea.vmem %s30_s19, 16384  ;;  %p2693_p1 = scmp.lt.s32.totalorder %s30_s19, %s30_s19 }
   0x6   :  { %p2689_p0 = scmp.ne.s32.totalorder %s30_s19, %s2688_s20  ;;  %p2694_p2 = scmp.lt.s32.totalorder %s2688_s20, %s2688_s20 }
   0x8   :  { %p2695_p3 = por %p2694_p2, %p2693_p1 }
   0xa   :  { %p2696_p4 = pnand %p2695_p3, %p2689_p0 }
   0xc   :  { %2699 = shalt.err (!%p2696_p4)
}
   0xd   :  { %s2789_s21 = smov 256   ;;  %s2790_s22 = smov 16  }
   0xe   :  { %35 = dma.hbm_to_vmem [thread:$0]  %s2898_s1, 16384, %s30_s19, [#allocation6], %s2789_s21, %s2789_s21, %s2790_s22  }
   0xf   :  { %s2791_s25 = smov [#allocation2]   ;;  %s2792_s27 = smov [#allocation7]  }
  0x10   :  { %s20_s26 = sshll.u32 %s2791_s25, 4  ;;  %s42_s28 = sshll.u32 %s2792_s27, 4  ;;  %s21_s26 = int_to_ptr.vmem [resolvable:$true] %s20_s26  ;;  %s43_s28 = int_to_ptr.vmem [resolvable:$true] %s42_s28 }
  0x11   :  { %s2708_s29 = scalar_lea.vmem %s21_s26, 256  ;;  %p2713_p6 = scmp.lt.s32.totalorder %s21_s26, %s21_s26 }
  0x12   :  { %p2709_p5 = scmp.ne.s32.totalorder %s21_s26, %s2708_s29  ;;  %p2714_p7 = scmp.lt.s32.totalorder %s2708_s29, %s2708_s29 }
  0x14   :  { %p2715_p8 = por %p2714_p7, %p2713_p6 }
  0x16   :  { %p2716_p9 = pnand %p2715_p8, %p2709_p5 }
  0x18   :  { %2719 = shalt.err (!%p2716_p9)
}
  0x19   :  { %23 = dma.hbm_to_vmem [thread:$0]  %s2897_s0, 256, %s21_s26, [#allocation3]  }
  0x1a   :  { %s2728_s7 = scalar_lea.vmem %s43_s28, 64  ;;  %p2733_p11 = scmp.lt.s32.totalorder %s43_s28, %s43_s28 }
  0x1b   :  { %p2729_p10 = scmp.ne.s32.totalorder %s43_s28, %s2728_s7  ;;  %p2734_p12 = scmp.lt.s32.totalorder %s2728_s7, %s2728_s7 }
  0x1d   :  { %p2735_p13 = por %p2734_p12, %p2733_p11 }
  0x1f   :  { %p2736_p0 = pnand %p2735_p13, %p2729_p10 }
  0x21   :  { %2739 = shalt.err (!%p2736_p0)
}
  0x22   :  { %45 = dma.hbm_to_vmem [thread:$0]  %s2899_s2, 64, %s43_s28, [#allocation6]  }
  0x23   :  { %s2793_s9 = smov [#allocation8]  }
  0x24   :  { %s51_s10 = sshll.u32 %s2793_s9, 4  ;;  %s52_s10 = int_to_ptr.vmem [resolvable:$true] %s51_s10 }
  0x25   :  { %s2748_s11 = scalar_lea.vmem %s52_s10, 16384  ;;  %p2753_p2 = scmp.lt.s32.totalorder %s52_s10, %s52_s10 }
  0x26   :  { %p2749_p1 = scmp.ne.s32.totalorder %s52_s10, %s2748_s11  ;;  %p2754_p3 = scmp.lt.s32.totalorder %s2748_s11, %s2748_s11 }
  0x28   :  { %p2755_p4 = por %p2754_p3, %p2753_p2 }
  0x2a   :  { %p2756_p5 = pnand %p2755_p4, %p2749_p1 }
  0x2c   :  { %2759 = shalt.err (!%p2756_p5)
}
  0x2d   :  { %57 = dma.hbm_to_vmem [thread:$0]  %s2900_s3, 16384, %s52_s10, [#allocation9], %s2789_s21, %s2789_s21, %s2790_s22  }
  0x2e   :  { %2780 = dma.done.wait [#allocation3], 256  }
  0x2f   :  { %2781 = vsyncadd [#allocation3], 4294967040 }
  0x30   :  { %2782 = dma.done.wait [#allocation6], 16448  }
  0x31   :  { %2783 = vsyncadd [#allocation6], 4294950848 }
  0x32   :  { %2784 = dma.done.wait [#allocation9], 16384  }
  0x33   :  { %2785 = vsyncadd [#allocation9], 4294950912  ;;  %v2292_v0 = vld [vmem:[#allocation5 + $0xe4] ss:$16 sps:$4 sm:$0xff]   ;;  %v2296_v2 = vld [vmem:[#allocation5 + $0xe0] ss:$16 sps:$4 sm:$0xff]  }
  0x34   :  { %v2294_v1 = vld [vmem:[#allocation5 + $0x2e4] ss:$16 sps:$4 sm:$0xff]   ;;  %878 = vmatprep.subr.bf16.mxu0 %v2292_v0  ;;  %v2297_v3 = vld [vmem:[#allocation5 + $0x2e0] ss:$16 sps:$4 sm:$0xff]   ;;  %v73_v48 = vld [vmem:[#allocation2 + $0x8] sm:$0xff] }
  0x35   :  { %919 = vmatprep.subr.bf16.mxu1 %v2294_v1  ;;  %v2298_v4 = vld [vmem:[#allocation5 + $0xc4] ss:$16 sps:$4 sm:$0xff]   ;;  %879 = vmatpush1.bf16.msra.mxu0 %v2296_v2  ;;  %v2302_v6 = vld [vmem:[#allocation5 + $0xc0] ss:$16 sps:$4 sm:$0xff]   ;;  %v2028_v51 = vcombine.high %v73_v48, %v73_v48 }
  0x36   :  { %920 = vmatpush1.bf16.msra.mxu1 %v2297_v3  ;;  %v2300_v5 = vld [vmem:[#allocation5 + $0x2c4] ss:$16 sps:$4 sm:$0xff]   ;;  %880 = vmatprep.subr.bf16.mxu0 %v2298_v4  ;;  %v2303_v7 = vld [vmem:[#allocation5 + $0x2c0] ss:$16 sps:$4 sm:$0xff]   ;;  %v2394_v4 = vld [vmem:[#allocation5 + $0xec] ss:$16 sps:$4 sm:$0xff]  }
  0x37   :  { %921 = vmatprep.subr.bf16.mxu1 %v2300_v5  ;;  %v2304_v8 = vld [vmem:[#allocation5 + $0xa4] ss:$16 sps:$4 sm:$0xff]   ;;  %v2308_v10 = vld [vmem:[#allocation5 + $0xa0] ss:$16 sps:$4 sm:$0xff]   ;;  %951 = vmatprep.mubr.bf16.mxu1 %v2028_v51  ;;  %v2397_v5 = vld [vmem:[#allocation5 + $0x2ec] ss:$16 sps:$4 sm:$0xff]  }
  0x38   :  { %v2306_v9 = vld [vmem:[#allocation5 + $0x2a4] ss:$16 sps:$4 sm:$0xff]   ;;  %v2309_v11 = vld [vmem:[#allocation5 + $0x2a0] ss:$16 sps:$4 sm:$0xff]  }
  0x39   :  { %881 = vmatpush1.bf16.msra.mxu0 %v2302_v6  ;;  %v2310_v12 = vld [vmem:[#allocation5 + $0x84] ss:$16 sps:$4 sm:$0xff]   ;;  %v2314_v14 = vld [vmem:[#allocation5 + $0x80] ss:$16 sps:$4 sm:$0xff]  }
  0x3a   :  { %922 = vmatpush1.bf16.msra.mxu1 %v2303_v7  ;;  %882 = vmatprep.subr.bf16.mxu0 %v2304_v8  ;;  %v2312_v13 = vld [vmem:[#allocation5 + $0x284] ss:$16 sps:$4 sm:$0xff]   ;;  %v2315_v15 = vld [vmem:[#allocation5 + $0x280] ss:$16 sps:$4 sm:$0xff]   ;;  %v2848_v7 = vcombine.low %v73_v48, %v73_v48  ;;  %v2392_v8 = vld [vmem:[#allocation5 + $0xe8] ss:$16 sps:$4 sm:$0xff]  }
  0x3b   :  { %923 = vmatprep.subr.bf16.mxu1 %v2306_v9  ;;  %v2316_v16 = vld [vmem:[#allocation5 + $0x64] ss:$16 sps:$4 sm:$0xff]   ;;  %v2320_v18 = vld [vmem:[#allocation5 + $0x60] ss:$16 sps:$4 sm:$0xff]   ;;  %v2395_v9 = vld [vmem:[#allocation5 + $0x2e8] ss:$16 sps:$4 sm:$0xff]  }
  0x3c   :  { %v2318_v17 = vld [vmem:[#allocation5 + $0x264] ss:$16 sps:$4 sm:$0xff]   ;;  %v2321_v19 = vld [vmem:[#allocation5 + $0x260] ss:$16 sps:$4 sm:$0xff]   ;;  %v2452_v48 = vld [vmem:[#allocation5 + $0x1a8] ss:$16 sps:$4 sm:$0xff]  }
  0x3d   :  { %883 = vmatpush1.bf16.msra.mxu0 %v2308_v10  ;;  %v2322_v20 = vld [vmem:[#allocation5 + $0x44] ss:$16 sps:$4 sm:$0xff]   ;;  %v2326_v22 = vld [vmem:[#allocation5 + $0x40] ss:$16 sps:$4 sm:$0xff]   ;;  %v2400_v10 = vld [vmem:[#allocation5 + $0xcc] ss:$16 sps:$4 sm:$0xff]  }
  0x3e   :  { %924 = vmatpush1.bf16.msra.mxu1 %v2309_v11  ;;  %884 = vmatprep.subr.bf16.mxu0 %v2310_v12  ;;  %v2324_v21 = vld [vmem:[#allocation5 + $0x244] ss:$16 sps:$4 sm:$0xff]   ;;  %v2327_v23 = vld [vmem:[#allocation5 + $0x240] ss:$16 sps:$4 sm:$0xff]   ;;  %v2403_v11 = vld [vmem:[#allocation5 + $0x2cc] ss:$16 sps:$4 sm:$0xff]  }
  0x3f   :  { %925 = vmatprep.subr.bf16.mxu1 %v2312_v13  ;;  %v2328_v24 = vld [vmem:[#allocation5 + $0x24] ss:$16 sps:$4 sm:$0xff]   ;;  %v2332_v26 = vld [vmem:[#allocation5 + $0x20] ss:$16 sps:$4 sm:$0xff]   ;;  %v2398_v12 = vld [vmem:[#allocation5 + $0xc8] ss:$16 sps:$4 sm:$0xff]  }
  0x40   :  { %v2330_v25 = vld [vmem:[#allocation5 + $0x224] ss:$16 sps:$4 sm:$0xff]   ;;  %v2333_v27 = vld [vmem:[#allocation5 + $0x220] ss:$16 sps:$4 sm:$0xff]   ;;  %v2401_v13 = vld [vmem:[#allocation5 + $0x2c8] ss:$16 sps:$4 sm:$0xff]  }
  0x41   :  { %885 = vmatpush1.bf16.msra.mxu0 %v2314_v14  ;;  %v2334_v28 = vld [vmem:[#allocation5 + $0x4] ss:$16 sps:$4 sm:$0xff]   ;;  %v2338_v30 = vld [vmem:[#allocation5] ss:$16 sps:$4 sm:$0xff]   ;;  %v2406_v14 = vld [vmem:[#allocation5 + $0xac] ss:$16 sps:$4 sm:$0xff]  }
  0x42   :  { %926 = vmatpush1.bf16.msra.mxu1 %v2315_v15  ;;  %886 = vmatprep.subr.bf16.mxu0 %v2316_v16  ;;  %v2336_v29 = vld [vmem:[#allocation5 + $0x204] ss:$16 sps:$4 sm:$0xff]   ;;  %v2339_v31 = vld [vmem:[#allocation5 + $0x200] ss:$16 sps:$4 sm:$0xff]   ;;  %v2409_v15 = vld [vmem:[#allocation5 + $0x2ac] ss:$16 sps:$4 sm:$0xff]  }
  0x43   :  { %927 = vmatprep.subr.bf16.mxu1 %v2318_v17  ;;  %v2340_v32 = vld [vmem:[#allocation5 + $0x1e4] ss:$16 sps:$4 sm:$0xff]   ;;  %v2344_v34 = vld [vmem:[#allocation5 + $0x1e0] ss:$16 sps:$4 sm:$0xff]   ;;  %v2404_v16 = vld [vmem:[#allocation5 + $0xa8] ss:$16 sps:$4 sm:$0xff]  }
  0x44   :  { %v2342_v33 = vld [vmem:[#allocation5 + $0x3e4] ss:$16 sps:$4 sm:$0xff]   ;;  %v2345_v35 = vld [vmem:[#allocation5 + $0x3e0] ss:$16 sps:$4 sm:$0xff]   ;;  %v2407_v17 = vld [vmem:[#allocation5 + $0x2a8] ss:$16 sps:$4 sm:$0xff]  }
  0x45   :  { %887 = vmatpush1.bf16.msra.mxu0 %v2320_v18  ;;  %v2346_v36 = vld [vmem:[#allocation5 + $0x1c4] ss:$16 sps:$4 sm:$0xff]   ;;  %v2350_v38 = vld [vmem:[#allocation5 + $0x1c0] ss:$16 sps:$4 sm:$0xff]   ;;  %v2412_v18 = vld [vmem:[#allocation5 + $0x8c] ss:$16 sps:$4 sm:$0xff]  }
  0x46   :  { %928 = vmatpush1.bf16.msra.mxu1 %v2321_v19  ;;  %888 = vmatprep.subr.bf16.mxu0 %v2322_v20  ;;  %v2348_v37 = vld [vmem:[#allocation5 + $0x3c4] ss:$16 sps:$4 sm:$0xff]   ;;  %v2351_v39 = vld [vmem:[#allocation5 + $0x3c0] ss:$16 sps:$4 sm:$0xff]   ;;  %v2415_v19 = vld [vmem:[#allocation5 + $0x28c] ss:$16 sps:$4 sm:$0xff]  }
  0x47   :  { %929 = vmatprep.subr.bf16.mxu1 %v2324_v21  ;;  %v2352_v40 = vld [vmem:[#allocation5 + $0x1a4] ss:$16 sps:$4 sm:$0xff]   ;;  %v2356_v42 = vld [vmem:[#allocation5 + $0x1a0] ss:$16 sps:$4 sm:$0xff]   ;;  %v2410_v20 = vld [vmem:[#allocation5 + $0x88] ss:$16 sps:$4 sm:$0xff]  }
  0x48   :  { %v2354_v41 = vld [vmem:[#allocation5 + $0x3a4] ss:$16 sps:$4 sm:$0xff]   ;;  %v2357_v43 = vld [vmem:[#allocation5 + $0x3a0] ss:$16 sps:$4 sm:$0xff]   ;;  %v2413_v21 = vld [vmem:[#allocation5 + $0x288] ss:$16 sps:$4 sm:$0xff]  }
  0x49   :  { %889 = vmatpush1.bf16.msra.mxu0 %v2326_v22  ;;  %v2358_v44 = vld [vmem:[#allocation5 + $0x184] ss:$16 sps:$4 sm:$0xff]   ;;  %v2362_v49 = vld [vmem:[#allocation5 + $0x180] ss:$16 sps:$4 sm:$0xff]   ;;  %v2418_v22 = vld [vmem:[#allocation5 + $0x6c] ss:$16 sps:$4 sm:$0xff]  }
  0x4a   :  { %930 = vmatpush1.bf16.msra.mxu1 %v2327_v23  ;;  %890 = vmatprep.subr.bf16.mxu0 %v2328_v24  ;;  %v2360_v45 = vld [vmem:[#allocation5 + $0x384] ss:$16 sps:$4 sm:$0xff]   ;;  %v2363_v50 = vld [vmem:[#allocation5 + $0x380] ss:$16 sps:$4 sm:$0xff]   ;;  %v2421_v23 = vld [vmem:[#allocation5 + $0x26c] ss:$16 sps:$4 sm:$0xff]  }
  0x4b   :  { %931 = vmatprep.subr.bf16.mxu1 %v2330_v25  ;;  %v72_v46 = vld [vmem:[#allocation2] sm:$0xff]  ;;  %v2416_v24 = vld [vmem:[#allocation5 + $0x68] ss:$16 sps:$4 sm:$0xff]  }
  0x4c   :  { %v2843_v47 = vcombine.high %v72_v46, %v72_v46  ;;  %v2364_v52 = vld [vmem:[#allocation5 + $0x164] ss:$16 sps:$4 sm:$0xff]   ;;  %v2368_v54 = vld [vmem:[#allocation5 + $0x160] ss:$16 sps:$4 sm:$0xff]   ;;  %v2846_v6 = vcombine.low %v72_v46, %v72_v46  ;;  %v2419_v25 = vld [vmem:[#allocation5 + $0x268] ss:$16 sps:$4 sm:$0xff]  }
  0x4d   :  { %891 = vmatpush1.bf16.msra.mxu0 %v2332_v26  ;;  %v2366_v53 = vld [vmem:[#allocation5 + $0x364] ss:$16 sps:$4 sm:$0xff]   ;;  %v2369_v55 = vld [vmem:[#allocation5 + $0x360] ss:$16 sps:$4 sm:$0xff]   ;;  %v2424_v26 = vld [vmem:[#allocation5 + $0x4c] ss:$16 sps:$4 sm:$0xff]  }
  0x4e   :  { %932 = vmatpush1.bf16.msra.mxu1 %v2333_v27  ;;  %892 = vmatprep.subr.bf16.mxu0 %v2334_v28  ;;  %v2370_v56 = vld [vmem:[#allocation5 + $0x144] ss:$16 sps:$4 sm:$0xff]   ;;  %v2374_v58 = vld [vmem:[#allocation5 + $0x140] ss:$16 sps:$4 sm:$0xff]   ;;  %v2427_v27 = vld [vmem:[#allocation5 + $0x24c] ss:$16 sps:$4 sm:$0xff]  }
  0x4f   :  { %933 = vmatprep.subr.bf16.mxu1 %v2336_v29  ;;  %910 = vmatprep.mubr.bf16.mxu0 %v2843_v47  ;;  %v2372_v57 = vld [vmem:[#allocation5 + $0x344] ss:$16 sps:$4 sm:$0xff]   ;;  %v2375_v59 = vld [vmem:[#allocation5 + $0x340] ss:$16 sps:$4 sm:$0xff]   ;;  %v2422_v28 = vld [vmem:[#allocation5 + $0x48] ss:$16 sps:$4 sm:$0xff]  }
  0x50   :  { %v2376_v60 = vld [vmem:[#allocation5 + $0x124] ss:$16 sps:$4 sm:$0xff]   ;;  %v2380_v62 = vld [vmem:[#allocation5 + $0x120] ss:$16 sps:$4 sm:$0xff]   ;;  %v2425_v29 = vld [vmem:[#allocation5 + $0x248] ss:$16 sps:$4 sm:$0xff]  }
  0x51   :  { %893 = vmatpush1.bf16.msra.mxu0 %v2338_v30  ;;  %v2378_v61 = vld [vmem:[#allocation5 + $0x324] ss:$16 sps:$4 sm:$0xff]   ;;  %v2381_v63 = vld [vmem:[#allocation5 + $0x320] ss:$16 sps:$4 sm:$0xff]   ;;  %v2430_v30 = vld [vmem:[#allocation5 + $0x2c] ss:$16 sps:$4 sm:$0xff]  }
  0x52   :  { %934 = vmatpush1.bf16.msra.mxu1 %v2339_v31  ;;  %894 = vmatprep.subr.bf16.mxu0 %v2340_v32  ;;  %v2382_v0 = vld [vmem:[#allocation5 + $0x104] ss:$16 sps:$4 sm:$0xff]   ;;  %v2386_v2 = vld [vmem:[#allocation5 + $0x100] ss:$16 sps:$4 sm:$0xff]   ;;  %v2433_v31 = vld [vmem:[#allocation5 + $0x22c] ss:$16 sps:$4 sm:$0xff]  }
  0x53   :  { %935 = vmatprep.subr.bf16.mxu1 %v2342_v33  ;;  %v2384_v1 = vld [vmem:[#allocation5 + $0x304] ss:$16 sps:$4 sm:$0xff]   ;;  %v2387_v3 = vld [vmem:[#allocation5 + $0x300] ss:$16 sps:$4 sm:$0xff]   ;;  %v2428_v32 = vld [vmem:[#allocation5 + $0x28] ss:$16 sps:$4 sm:$0xff]  }
  0x54   :  { %v2431_v33 = vld [vmem:[#allocation5 + $0x228] ss:$16 sps:$4 sm:$0xff]   ;;  %v2454_v46 = vld [vmem:[#allocation5 + $0x1ac] ss:$16 sps:$4 sm:$0xff]  }
  0x55   :  { %895 = vmatpush2.bf16.msra.mxu0 %v2344_v34  ;;  %v2436_v34 = vld [vmem:[#allocation5 + $0xc] ss:$16 sps:$4 sm:$0xff]  }
  0x56   :  { %936 = vmatpush2.bf16.msra.mxu1 %v2345_v35  ;;  %896 = vmatprep.subr.bf16.mxu0 %v2346_v36  ;;  %v2439_v35 = vld [vmem:[#allocation5 + $0x20c] ss:$16 sps:$4 sm:$0xff]   ;;  %v2434_v36 = vld [vmem:[#allocation5 + $0x8] ss:$16 sps:$4 sm:$0xff]  }
  0x57   :  { %937 = vmatprep.subr.bf16.mxu1 %v2348_v37  ;;  %v2437_v37 = vld [vmem:[#allocation5 + $0x208] ss:$16 sps:$4 sm:$0xff]  }
  0x59   :  { %897 = vmatpush2.bf16.msra.mxu0 %v2350_v38  ;;  %v2442_v38 = vld [vmem:[#allocation5 + $0x1ec] ss:$16 sps:$4 sm:$0xff]  }
  0x5a   :  { %938 = vmatpush2.bf16.msra.mxu1 %v2351_v39  ;;  %898 = vmatprep.subr.bf16.mxu0 %v2352_v40  ;;  %v2445_v39 = vld [vmem:[#allocation5 + $0x3ec] ss:$16 sps:$4 sm:$0xff]   ;;  %v2440_v40 = vld [vmem:[#allocation5 + $0x1e8] ss:$16 sps:$4 sm:$0xff]  }
  0x5b   :  { %939 = vmatprep.subr.bf16.mxu1 %v2354_v41  ;;  %v2443_v41 = vld [vmem:[#allocation5 + $0x3e8] ss:$16 sps:$4 sm:$0xff]  }
  0x5d   :  { %899 = vmatpush2.bf16.msra.mxu0 %v2356_v42  ;;  %v2448_v42 = vld [vmem:[#allocation5 + $0x1cc] ss:$16 sps:$4 sm:$0xff]  }
  0x5e   :  { %940 = vmatpush2.bf16.msra.mxu1 %v2357_v43  ;;  %900 = vmatprep.subr.bf16.mxu0 %v2358_v44  ;;  %v2451_v43 = vld [vmem:[#allocation5 + $0x3cc] ss:$16 sps:$4 sm:$0xff]   ;;  %v2446_v44 = vld [vmem:[#allocation5 + $0x1c8] ss:$16 sps:$4 sm:$0xff]  }
  0x5f   :  { %941 = vmatprep.subr.bf16.mxu1 %v2360_v45  ;;  %v2449_v45 = vld [vmem:[#allocation5 + $0x3c8] ss:$16 sps:$4 sm:$0xff]  }
  0x61   :  { %901 = vmatpush2.bf16.msra.mxu0 %v2362_v49  ;;  %v2455_v49 = vld [vmem:[#allocation5 + $0x3a8] ss:$16 sps:$4 sm:$0xff]  }
  0x62   :  { %942 = vmatpush2.bf16.msra.mxu1 %v2363_v50  ;;  %902 = vmatprep.subr.bf16.mxu0 %v2364_v52  ;;  %v2460_v50 = vld [vmem:[#allocation5 + $0x18c] ss:$16 sps:$4 sm:$0xff]   ;;  %v2458_v52 = vld [vmem:[#allocation5 + $0x188] ss:$16 sps:$4 sm:$0xff]  }
  0x63   :  { %943 = vmatprep.subr.bf16.mxu1 %v2366_v53  ;;  %v2461_v53 = vld [vmem:[#allocation5 + $0x388] ss:$16 sps:$4 sm:$0xff]  }
  0x65   :  { %903 = vmatpush2.bf16.msra.mxu0 %v2368_v54  ;;  %v2466_v54 = vld [vmem:[#allocation5 + $0x16c] ss:$16 sps:$4 sm:$0xff]  }
  0x66   :  { %944 = vmatpush2.bf16.msra.mxu1 %v2369_v55  ;;  %904 = vmatprep.subr.bf16.mxu0 %v2370_v56  ;;  %v2469_v55 = vld [vmem:[#allocation5 + $0x36c] ss:$16 sps:$4 sm:$0xff]   ;;  %v2464_v56 = vld [vmem:[#allocation5 + $0x168] ss:$16 sps:$4 sm:$0xff]  }
  0x67   :  { %945 = vmatprep.subr.bf16.mxu1 %v2372_v57  ;;  %v2467_v57 = vld [vmem:[#allocation5 + $0x368] ss:$16 sps:$4 sm:$0xff]  }
  0x69   :  { %905 = vmatpush2.bf16.msra.mxu0 %v2374_v58  ;;  %v2472_v58 = vld [vmem:[#allocation5 + $0x14c] ss:$16 sps:$4 sm:$0xff]  }
  0x6a   :  { %946 = vmatpush2.bf16.msra.mxu1 %v2375_v59  ;;  %906 = vmatprep.subr.bf16.mxu0 %v2376_v60  ;;  %v2475_v59 = vld [vmem:[#allocation5 + $0x34c] ss:$16 sps:$4 sm:$0xff]   ;;  %v2470_v60 = vld [vmem:[#allocation5 + $0x148] ss:$16 sps:$4 sm:$0xff]  }
  0x6b   :  { %947 = vmatprep.subr.bf16.mxu1 %v2378_v61  ;;  %v2473_v61 = vld [vmem:[#allocation5 + $0x348] ss:$16 sps:$4 sm:$0xff]  }
  0x6d   :  { %907 = vmatpush2.bf16.msra.mxu0 %v2380_v62  ;;  %v2478_v62 = vld [vmem:[#allocation5 + $0x12c] ss:$16 sps:$4 sm:$0xff]  }
  0x6e   :  { %948 = vmatpush2.bf16.msra.mxu1 %v2381_v63  ;;  %908 = vmatprep.subr.bf16.mxu0 %v2382_v0  ;;  %v2481_v63 = vld [vmem:[#allocation5 + $0x32c] ss:$16 sps:$4 sm:$0xff]   ;;  %v2476_v0 = vld [vmem:[#allocation5 + $0x128] ss:$16 sps:$4 sm:$0xff]  }
  0x6f   :  { %949 = vmatprep.subr.bf16.mxu1 %v2384_v1  ;;  %v2479_v1 = vld [vmem:[#allocation5 + $0x328] ss:$16 sps:$4 sm:$0xff]  }
  0x71   :  { %909 = vmatpush2.bf16.msra.mxu0 %v2386_v2  ;;  %v2484_v2 = vld [vmem:[#allocation5 + $0x10c] ss:$16 sps:$4 sm:$0xff]  }
  0x72   :  { %950 = vmatpush2.bf16.msra.mxu1 %v2387_v3  ;;  %960 = vmatprep.subr.bf16.mxu0 %v2394_v4  ;;  %v2487_v3 = vld [vmem:[#allocation5 + $0x30c] ss:$16 sps:$4 sm:$0xff]   ;;  %v2482_v4 = vld [vmem:[#allocation5 + $0x108] ss:$16 sps:$4 sm:$0xff]  }
  0x73   :  { %1001 = vmatprep.subr.bf16.mxu1 %v2397_v5  ;;  %v2485_v5 = vld [vmem:[#allocation5 + $0x308] ss:$16 sps:$4 sm:$0xff]  }
  0x74   :  { %911 = vmatmul.mubr.bf16.vlgmr.msra.gmra.mxu0 %v2846_v6 }
  0x75   :  { %952 = vmatmul.mubr.bf16.vlgmr.msra.gmra.mxu1 %v2848_v7  ;;  %961 = vmatpush1.bf16.msra.mxu0 %v2392_v8  ;;  %v2490_v8 = vld [vmem:[#allocation8 + $0xe4] ss:$16 sps:$4 sm:$0xff]  }
  0x76   :  { %1002 = vmatpush1.bf16.msra.mxu1 %v2395_v9  ;;  %962 = vmatprep.subr.bf16.mxu0 %v2400_v10  ;;  %v2488_v9 = vld [vmem:[#allocation8 + $0xe0] ss:$16 sps:$4 sm:$0xff]   ;;  %v2493_v10 = vld [vmem:[#allocation8 + $0xc4] ss:$16 sps:$4 sm:$0xff]  }
  0x77   :  { %1003 = vmatprep.subr.bf16.mxu1 %v2403_v11  ;;  %992 = vmatprep.mubr.bf16.mxu0 %v2843_v47  ;;  %v2457_v47 = vld [vmem:[#allocation5 + $0x3ac] ss:$16 sps:$4 sm:$0xff]   ;;  %v2491_v11 = vld [vmem:[#allocation8 + $0xc0] ss:$16 sps:$4 sm:$0xff]  }
  0x78   :  { %1033 = vmatprep.mubr.bf16.mxu1 %v2028_v51  ;;  %v2463_v51 = vld [vmem:[#allocation5 + $0x38c] ss:$16 sps:$4 sm:$0xff]  }
  0x79   :  { %963 = vmatpush1.bf16.msra.mxu0 %v2398_v12  ;;  %v2496_v12 = vld [vmem:[#allocation8 + $0xa4] ss:$16 sps:$4 sm:$0xff]  }
  0x7a   :  { %1004 = vmatpush1.bf16.msra.mxu1 %v2401_v13  ;;  %964 = vmatprep.subr.bf16.mxu0 %v2406_v14  ;;  %v2494_v13 = vld [vmem:[#allocation8 + $0xa0] ss:$16 sps:$4 sm:$0xff]   ;;  %v2499_v14 = vld [vmem:[#allocation8 + $0x84] ss:$16 sps:$4 sm:$0xff]  }
  0x7b   :  { %1005 = vmatprep.subr.bf16.mxu1 %v2409_v15  ;;  %v2497_v15 = vld [vmem:[#allocation8 + $0x80] ss:$16 sps:$4 sm:$0xff]  }
  0x7d   :  { %965 = vmatpush1.bf16.msra.mxu0 %v2404_v16  ;;  %v2538_v16 = vld [vmem:[#allocation8 + $0x2e4] ss:$16 sps:$4 sm:$0xff]  }
  0x7e   :  { %1006 = vmatpush1.bf16.msra.mxu1 %v2407_v17  ;;  %966 = vmatprep.subr.bf16.mxu0 %v2412_v18  ;;  %v2502_v17 = vld [vmem:[#allocation8 + $0x64] ss:$16 sps:$4 sm:$0xff]   ;;  %v2536_v18 = vld [vmem:[#allocation8 + $0x2e0] ss:$16 sps:$4 sm:$0xff]  }
  0x7f   :  { %1007 = vmatprep.subr.bf16.mxu1 %v2415_v19  ;;  %v2542_v19 = vld [vmem:[#allocation8 + $0x2c0] ss:$16 sps:$4 sm:$0xff]  }
  0x81   :  { %967 = vmatpush1.bf16.msra.mxu0 %v2410_v20  ;;  %v2505_v20 = vld [vmem:[#allocation8 + $0x44] ss:$16 sps:$4 sm:$0xff]  }
  0x82   :  { %1008 = vmatpush1.bf16.msra.mxu1 %v2413_v21  ;;  %968 = vmatprep.subr.bf16.mxu0 %v2418_v22  ;;  %v2503_v21 = vld [vmem:[#allocation8 + $0x40] ss:$16 sps:$4 sm:$0xff]  }
  0x83   :  { %1009 = vmatprep.subr.bf16.mxu1 %v2421_v23  ;;  %v2548_v22 = vld [vmem:[#allocation8 + $0x2a0] ss:$16 sps:$4 sm:$0xff]   ;;  %v2550_v23 = vld [vmem:[#allocation8 + $0x2a4] ss:$16 sps:$4 sm:$0xff]  }
  0x85   :  { %969 = vmatpush1.bf16.msra.mxu0 %v2416_v24  ;;  %v2508_v24 = vld [vmem:[#allocation8 + $0x24] ss:$16 sps:$4 sm:$0xff]  }
  0x86   :  { %1010 = vmatpush1.bf16.msra.mxu1 %v2419_v25  ;;  %970 = vmatprep.subr.bf16.mxu0 %v2424_v26  ;;  %v2506_v25 = vld [vmem:[#allocation8 + $0x20] ss:$16 sps:$4 sm:$0xff]  }
  0x87   :  { %1011 = vmatprep.subr.bf16.mxu1 %v2427_v27  ;;  %v2554_v26 = vld [vmem:[#allocation8 + $0x280] ss:$16 sps:$4 sm:$0xff]   ;;  %v2556_v27 = vld [vmem:[#allocation8 + $0x284] ss:$16 sps:$4 sm:$0xff]  }
  0x89   :  { %971 = vmatpush1.bf16.msra.mxu0 %v2422_v28  ;;  %v2511_v28 = vld [vmem:[#allocation8 + $0x4] ss:$16 sps:$4 sm:$0xff]  }
  0x8a   :  { %1012 = vmatpush1.bf16.msra.mxu1 %v2425_v29  ;;  %972 = vmatprep.subr.bf16.mxu0 %v2430_v30  ;;  %v2509_v29 = vld [vmem:[#allocation8] ss:$16 sps:$4 sm:$0xff]  }
  0x8b   :  { %1013 = vmatprep.subr.bf16.mxu1 %v2433_v31  ;;  %v2560_v30 = vld [vmem:[#allocation8 + $0x260] ss:$16 sps:$4 sm:$0xff]   ;;  %v2562_v31 = vld [vmem:[#allocation8 + $0x264] ss:$16 sps:$4 sm:$0xff]  }
  0x8d   :  { %973 = vmatpush1.bf16.msra.mxu0 %v2428_v32  ;;  %v2514_v32 = vld [vmem:[#allocation8 + $0x1e4] ss:$16 sps:$4 sm:$0xff]  }
  0x8e   :  { %1014 = vmatpush1.bf16.msra.mxu1 %v2431_v33  ;;  %974 = vmatprep.subr.bf16.mxu0 %v2436_v34  ;;  %v2512_v33 = vld [vmem:[#allocation8 + $0x1e0] ss:$16 sps:$4 sm:$0xff]  }
  0x8f   :  { %1015 = vmatprep.subr.bf16.mxu1 %v2439_v35  ;;  %v2566_v34 = vld [vmem:[#allocation8 + $0x240] ss:$16 sps:$4 sm:$0xff]   ;;  %v2568_v35 = vld [vmem:[#allocation8 + $0x244] ss:$16 sps:$4 sm:$0xff]  }
  0x91   :  { %975 = vmatpush1.bf16.msra.mxu0 %v2434_v36  ;;  %v2517_v36 = vld [vmem:[#allocation8 + $0x1c4] ss:$16 sps:$4 sm:$0xff]  }
  0x92   :  { %1016 = vmatpush1.bf16.msra.mxu1 %v2437_v37  ;;  %976 = vmatprep.subr.bf16.mxu0 %v2442_v38  ;;  %v2515_v37 = vld [vmem:[#allocation8 + $0x1c0] ss:$16 sps:$4 sm:$0xff]  }
  0x93   :  { %1017 = vmatprep.subr.bf16.mxu1 %v2445_v39  ;;  %v2572_v38 = vld [vmem:[#allocation8 + $0x220] ss:$16 sps:$4 sm:$0xff]   ;;  %v2574_v39 = vld [vmem:[#allocation8 + $0x224] ss:$16 sps:$4 sm:$0xff]  }
  0x95   :  { %977 = vmatpush2.bf16.msra.mxu0 %v2440_v40  ;;  %v2520_v40 = vld [vmem:[#allocation8 + $0x1a4] ss:$16 sps:$4 sm:$0xff]  }
  0x96   :  { %1018 = vmatpush2.bf16.msra.mxu1 %v2443_v41  ;;  %978 = vmatprep.subr.bf16.mxu0 %v2448_v42  ;;  %v2518_v41 = vld [vmem:[#allocation8 + $0x1a0] ss:$16 sps:$4 sm:$0xff]  }
  0x97   :  { %1019 = vmatprep.subr.bf16.mxu1 %v2451_v43  ;;  %v2578_v42 = vld [vmem:[#allocation8 + $0x200] ss:$16 sps:$4 sm:$0xff]   ;;  %v2580_v43 = vld [vmem:[#allocation8 + $0x204] ss:$16 sps:$4 sm:$0xff]  }
  0x99   :  { %979 = vmatpush2.bf16.msra.mxu0 %v2446_v44  ;;  %v2523_v44 = vld [vmem:[#allocation8 + $0x184] ss:$16 sps:$4 sm:$0xff]  }
  0x9a   :  { %1020 = vmatpush2.bf16.msra.mxu1 %v2449_v45  ;;  %980 = vmatprep.subr.bf16.mxu0 %v2454_v46  ;;  %v2521_v45 = vld [vmem:[#allocation8 + $0x180] ss:$16 sps:$4 sm:$0xff]  }
  0x9b   :  { %1021 = vmatprep.subr.bf16.mxu1 %v2457_v47  ;;  %v2584_v46 = vld [vmem:[#allocation8 + $0x3e0] ss:$16 sps:$4 sm:$0xff]   ;;  %v2586_v47 = vld [vmem:[#allocation8 + $0x3e4] ss:$16 sps:$4 sm:$0xff]  }
  0x9d   :  { %981 = vmatpush2.bf16.msra.mxu0 %v2452_v48  ;;  %v2526_v48 = vld [vmem:[#allocation8 + $0x164] ss:$16 sps:$4 sm:$0xff]  }
  0x9e   :  { %1022 = vmatpush2.bf16.msra.mxu1 %v2455_v49  ;;  %982 = vmatprep.subr.bf16.mxu0 %v2460_v50  ;;  %v2524_v49 = vld [vmem:[#allocation8 + $0x160] ss:$16 sps:$4 sm:$0xff]  }
  0x9f   :  { %1023 = vmatprep.subr.bf16.mxu1 %v2463_v51  ;;  %v2590_v50 = vld [vmem:[#allocation8 + $0x3c0] ss:$16 sps:$4 sm:$0xff]   ;;  %v2592_v51 = vld [vmem:[#allocation8 + $0x3c4] ss:$16 sps:$4 sm:$0xff]  }
  0xa1   :  { %983 = vmatpush2.bf16.msra.mxu0 %v2458_v52  ;;  %v2529_v52 = vld [vmem:[#allocation8 + $0x144] ss:$16 sps:$4 sm:$0xff]  }
  0xa2   :  { %1024 = vmatpush2.bf16.msra.mxu1 %v2461_v53  ;;  %984 = vmatprep.subr.bf16.mxu0 %v2466_v54  ;;  %v2527_v53 = vld [vmem:[#allocation8 + $0x140] ss:$16 sps:$4 sm:$0xff]  }
  0xa3   :  { %1025 = vmatprep.subr.bf16.mxu1 %v2469_v55  ;;  %v2596_v54 = vld [vmem:[#allocation8 + $0x3a0] ss:$16 sps:$4 sm:$0xff]   ;;  %v2598_v55 = vld [vmem:[#allocation8 + $0x3a4] ss:$16 sps:$4 sm:$0xff]  }
  0xa5   :  { %985 = vmatpush2.bf16.msra.mxu0 %v2464_v56  ;;  %v2532_v56 = vld [vmem:[#allocation8 + $0x124] ss:$16 sps:$4 sm:$0xff]  }
  0xa6   :  { %1026 = vmatpush2.bf16.msra.mxu1 %v2467_v57  ;;  %986 = vmatprep.subr.bf16.mxu0 %v2472_v58  ;;  %v2530_v57 = vld [vmem:[#allocation8 + $0x120] ss:$16 sps:$4 sm:$0xff]  }
  0xa7   :  { %1027 = vmatprep.subr.bf16.mxu1 %v2475_v59  ;;  %v2602_v58 = vld [vmem:[#allocation8 + $0x380] ss:$16 sps:$4 sm:$0xff]   ;;  %v2604_v59 = vld [vmem:[#allocation8 + $0x384] ss:$16 sps:$4 sm:$0xff]  }
  0xa9   :  { %987 = vmatpush2.bf16.msra.mxu0 %v2470_v60  ;;  %v2535_v60 = vld [vmem:[#allocation8 + $0x104] ss:$16 sps:$4 sm:$0xff]  }
  0xaa   :  { %1028 = vmatpush2.bf16.msra.mxu1 %v2473_v61  ;;  %988 = vmatprep.subr.bf16.mxu0 %v2478_v62  ;;  %v2533_v61 = vld [vmem:[#allocation8 + $0x100] ss:$16 sps:$4 sm:$0xff]  }
  0xab   :  { %1029 = vmatprep.subr.bf16.mxu1 %v2481_v63  ;;  %v2608_v62 = vld [vmem:[#allocation8 + $0x360] ss:$16 sps:$4 sm:$0xff]   ;;  %v2610_v63 = vld [vmem:[#allocation8 + $0x364] ss:$16 sps:$4 sm:$0xff]  }
  0xad   :  { %989 = vmatpush2.bf16.msra.mxu0 %v2476_v0  ;;  %v2541_v0 = vld [vmem:[#allocation8 + $0xec] ss:$16 sps:$4 sm:$0xff]  }
  0xae   :  { %1030 = vmatpush2.bf16.msra.mxu1 %v2479_v1  ;;  %990 = vmatprep.subr.bf16.mxu0 %v2484_v2  ;;  %v2614_v1 = vld [vmem:[#allocation8 + $0x340] ss:$16 sps:$4 sm:$0xff]   ;;  %v2616_v2 = vld [vmem:[#allocation8 + $0x344] ss:$16 sps:$4 sm:$0xff]  }
  0xaf   :  { %1031 = vmatprep.subr.bf16.mxu1 %v2487_v3  ;;  %v2622_v3 = vld [vmem:[#allocation8 + $0x324] ss:$16 sps:$4 sm:$0xff]  }
  0xb1   :  { %991 = vmatpush2.bf16.msra.mxu0 %v2482_v4  ;;  %v2620_v4 = vld [vmem:[#allocation8 + $0x320] ss:$16 sps:$4 sm:$0xff]  }
  0xb2   :  { %1032 = vmatpush2.bf16.msra.mxu1 %v2485_v5  ;;  %1840 = vmatprep.subr.bf16.mxu0 %v2490_v8  ;;  %v2628_v5 = vld [vmem:[#allocation8 + $0x304] ss:$16 sps:$4 sm:$0xff]   ;;  %v2626_v8 = vld [vmem:[#allocation8 + $0x300] ss:$16 sps:$4 sm:$0xff]  }
  0xb3   :  { %1881 = vmatprep.subr.bf16.mxu1 %v2538_v16 }
  0xb4   :  { %993 = vmatmul.mubr.bf16.vlgmr.msra.gmra.mxu0 %v2846_v6  ;;  %v2500_v6 = vld [vmem:[#allocation8 + $0x60] ss:$16 sps:$4 sm:$0xff]  }
  0xb5   :  { %1034 = vmatmul.mubr.bf16.vlgmr.msra.gmra.mxu1 %v2848_v7  ;;  %1841 = vmatpush1.bf16.msra.mxu0 %v2488_v9  ;;  %v2544_v7 = vld [vmem:[#allocation8 + $0x2c4] ss:$16 sps:$4 sm:$0xff]   ;;  %v2634_v9 = vld [vmem:[#allocation8 + $0x2ec] ss:$16 sps:$4 sm:$0xff]  }
  0xb6   :  { %1842 = vmatprep.subr.bf16.mxu0 %v2493_v10  ;;  %1882 = vmatpush1.bf16.msra.mxu1 %v2536_v18  ;;  %v204_v10 = vlaneseq }
  0xb7   :  { %1883 = vmatprep.subr.bf16.mxu1 %v2544_v7 }
  0xb9   :  { %1843 = vmatpush1.bf16.msra.mxu0 %v2491_v11  ;;  %v2855_v11 = vshrl.u32 %v204_v10, 7 }
  0xba   :  { %1844 = vmatprep.subr.bf16.mxu0 %v2496_v12  ;;  %1884 = vmatpush1.bf16.msra.mxu1 %v2542_v19 }
  0xbb   :  { %1885 = vmatprep.subr.bf16.mxu1 %v2550_v23  ;;  %v206_v12 = vsub.s32 0, %v2855_v11 }
  0xbd   :  { %1845 = vmatpush1.bf16.msra.mxu0 %v2494_v13  ;;  %v2858_v13 = vld [vmem:[#allocation7] sm:$0xf] }
  0xbe   :  { %1846 = vmatprep.subr.bf16.mxu0 %v2499_v14  ;;  %1886 = vmatpush1.bf16.msra.mxu1 %v2548_v22  ;;  %v210_v14 = vsub.s32 1, %v2855_v11 }
  0xbf   :  { %1887 = vmatprep.subr.bf16.mxu1 %v2556_v27 }
  0xc0   :  { %v211_v16 = vrot.slane %v2858_v13, %v210_v14 }
  0xc1   :  { %1847 = vmatpush1.bf16.msra.mxu0 %v2497_v15  ;;  %v207_v15 = vrot.slane %v2858_v13, %v206_v12 }
  0xc2   :  { %1848 = vmatprep.subr.bf16.mxu0 %v2502_v17  ;;  %1888 = vmatpush1.bf16.msra.mxu1 %v2554_v26 }
  0xc3   :  { %1889 = vmatprep.subr.bf16.mxu1 %v2562_v31 }
  0xc5   :  { %1849 = vmatpush1.bf16.msra.mxu0 %v2500_v6 }
  0xc6   :  { %1850 = vmatprep.subr.bf16.mxu0 %v2505_v20  ;;  %1890 = vmatpush1.bf16.msra.mxu1 %v2560_v30  ;;  %v2539_v30 = vld [vmem:[#allocation8 + $0xe8] ss:$16 sps:$4 sm:$0xff]  }
  0xc7   :  { %1891 = vmatprep.subr.bf16.mxu1 %v2568_v35  ;;  %v2551_v35 = vld [vmem:[#allocation8 + $0xa8] ss:$16 sps:$4 sm:$0xff]  }
  0xc9   :  { %1851 = vmatpush1.bf16.msra.mxu0 %v2503_v21 }
  0xca   :  { %1852 = vmatprep.subr.bf16.mxu0 %v2508_v24  ;;  %1892 = vmatpush1.bf16.msra.mxu1 %v2566_v34  ;;  %v2553_v34 = vld [vmem:[#allocation8 + $0xac] ss:$16 sps:$4 sm:$0xff]  }
  0xcb   :  { %1893 = vmatprep.subr.bf16.mxu1 %v2574_v39  ;;  %v2563_v39 = vld [vmem:[#allocation8 + $0x68] ss:$16 sps:$4 sm:$0xff]  }
  0xcd   :  { %1853 = vmatpush1.bf16.msra.mxu0 %v2506_v25 }
  0xce   :  { %1854 = vmatprep.subr.bf16.mxu0 %v2511_v28  ;;  %1894 = vmatpush1.bf16.msra.mxu1 %v2572_v38  ;;  %v2565_v38 = vld [vmem:[#allocation8 + $0x6c] ss:$16 sps:$4 sm:$0xff]  }
  0xcf   :  { %1895 = vmatprep.subr.bf16.mxu1 %v2580_v43  ;;  %v2575_v43 = vld [vmem:[#allocation8 + $0x28] ss:$16 sps:$4 sm:$0xff]  }
  0xd1   :  { %1855 = vmatpush1.bf16.msra.mxu0 %v2509_v29 }
  0xd2   :  { %1856 = vmatprep.subr.bf16.mxu0 %v2514_v32  ;;  %1896 = vmatpush1.bf16.msra.mxu1 %v2578_v42  ;;  %v2547_v32 = vld [vmem:[#allocation8 + $0xcc] ss:$16 sps:$4 sm:$0xff]  }
  0xd3   :  { %1897 = vmatprep.subr.bf16.mxu1 %v2586_v47  ;;  %v2577_v42 = vld [vmem:[#allocation8 + $0x2c] ss:$16 sps:$4 sm:$0xff]   ;;  %v2587_v47 = vld [vmem:[#allocation8 + $0x1e8] ss:$16 sps:$4 sm:$0xff]  }
  0xd5   :  { %1857 = vmatpush2.bf16.msra.mxu0 %v2512_v33  ;;  %v2545_v33 = vld [vmem:[#allocation8 + $0xc8] ss:$16 sps:$4 sm:$0xff]  }
  0xd6   :  { %1858 = vmatprep.subr.bf16.mxu0 %v2517_v36  ;;  %1898 = vmatpush2.bf16.msra.mxu1 %v2584_v46  ;;  %v2559_v36 = vld [vmem:[#allocation8 + $0x8c] ss:$16 sps:$4 sm:$0xff]  }
  0xd7   :  { %1899 = vmatprep.subr.bf16.mxu1 %v2592_v51  ;;  %v2589_v46 = vld [vmem:[#allocation8 + $0x1ec] ss:$16 sps:$4 sm:$0xff]   ;;  %v2599_v51 = vld [vmem:[#allocation8 + $0x1a8] ss:$16 sps:$4 sm:$0xff]  }
  0xd9   :  { %1859 = vmatpush2.bf16.msra.mxu0 %v2515_v37  ;;  %v2557_v37 = vld [vmem:[#allocation8 + $0x88] ss:$16 sps:$4 sm:$0xff]  }
  0xda   :  { %1860 = vmatprep.subr.bf16.mxu0 %v2520_v40  ;;  %1900 = vmatpush2.bf16.msra.mxu1 %v2590_v50  ;;  %v2571_v40 = vld [vmem:[#allocation8 + $0x4c] ss:$16 sps:$4 sm:$0xff]  }
  0xdb   :  { %1901 = vmatprep.subr.bf16.mxu1 %v2598_v55  ;;  %v2601_v50 = vld [vmem:[#allocation8 + $0x1ac] ss:$16 sps:$4 sm:$0xff]   ;;  %v2611_v55 = vld [vmem:[#allocation8 + $0x168] ss:$16 sps:$4 sm:$0xff]  }
  0xdd   :  { %1861 = vmatpush2.bf16.msra.mxu0 %v2518_v41  ;;  %v2569_v41 = vld [vmem:[#allocation8 + $0x48] ss:$16 sps:$4 sm:$0xff]  }
  0xde   :  { %1862 = vmatprep.subr.bf16.mxu0 %v2523_v44  ;;  %1902 = vmatpush2.bf16.msra.mxu1 %v2596_v54  ;;  %v2583_v44 = vld [vmem:[#allocation8 + $0xc] ss:$16 sps:$4 sm:$0xff]  }
  0xdf   :  { %1903 = vmatprep.subr.bf16.mxu1 %v2604_v59  ;;  %v2613_v54 = vld [vmem:[#allocation8 + $0x16c] ss:$16 sps:$4 sm:$0xff]   ;;  %v2617_v59 = vld [vmem:[#allocation8 + $0x148] ss:$16 sps:$4 sm:$0xff]  }
  0xe1   :  { %1863 = vmatpush2.bf16.msra.mxu0 %v2521_v45  ;;  %v2581_v45 = vld [vmem:[#allocation8 + $0x8] ss:$16 sps:$4 sm:$0xff]  }
  0xe2   :  { %1864 = vmatprep.subr.bf16.mxu0 %v2526_v48  ;;  %1904 = vmatpush2.bf16.msra.mxu1 %v2602_v58  ;;  %v2595_v48 = vld [vmem:[#allocation8 + $0x1cc] ss:$16 sps:$4 sm:$0xff]   ;;  %v218_v58 = vsub.s32 3, %v2855_v11 }
  0xe3   :  { %1905 = vmatprep.subr.bf16.mxu1 %v2610_v63 }
  0xe5   :  { %1865 = vmatpush2.bf16.msra.mxu0 %v2524_v49  ;;  %v2593_v49 = vld [vmem:[#allocation8 + $0x1c8] ss:$16 sps:$4 sm:$0xff]  }
  0xe6   :  { %1866 = vmatprep.subr.bf16.mxu0 %v2529_v52  ;;  %1906 = vmatpush2.bf16.msra.mxu1 %v2608_v62  ;;  %v2607_v52 = vld [vmem:[#allocation8 + $0x18c] ss:$16 sps:$4 sm:$0xff]   ;;  %v219_v62 = vrot.slane %v2858_v13, %v218_v58 }
  0xe7   :  { %1907 = vmatprep.subr.bf16.mxu1 %v2616_v2  ;;  %v2623_v2 = vld [vmem:[#allocation8 + $0x128] ss:$16 sps:$4 sm:$0xff]  }
  0xe9   :  { %1867 = vmatpush2.bf16.msra.mxu0 %v2527_v53  ;;  %v2605_v53 = vld [vmem:[#allocation8 + $0x188] ss:$16 sps:$4 sm:$0xff]  }
  0xea   :  { %1868 = vmatprep.subr.bf16.mxu0 %v2532_v56  ;;  %1908 = vmatpush2.bf16.msra.mxu1 %v2614_v1  ;;  %v214_v56 = vsub.s32 2, %v2855_v11 }
  0xeb   :  { %1909 = vmatprep.subr.bf16.mxu1 %v2622_v3 }
  0xed   :  { %1869 = vmatpush2.bf16.msra.mxu0 %v2530_v57  ;;  %v2619_v57 = vld [vmem:[#allocation8 + $0x14c] ss:$16 sps:$4 sm:$0xff]  }
  0xee   :  { %1870 = vmatprep.subr.bf16.mxu0 %v2535_v60  ;;  %1910 = vmatpush2.bf16.msra.mxu1 %v2620_v4  ;;  %v215_v60 = vrot.slane %v2858_v13, %v214_v56 }
  0xef   :  { %1911 = vmatprep.subr.bf16.mxu1 %v2628_v5  ;;  %v2631_v5 = vld [vmem:[#allocation8 + $0x10c] ss:$16 sps:$4 sm:$0xff]  }
  0xf1   :  { %1871 = vmatpush2.bf16.msra.mxu0 %v2533_v61  ;;  %v2625_v61 = vld [vmem:[#allocation8 + $0x12c] ss:$16 sps:$4 sm:$0xff]  }
  0xf2   :  { %1922 = vmatprep.subr.bf16.mxu0 %v2541_v0  ;;  %1912 = vmatpush2.bf16.msra.mxu1 %v2626_v8 }
  0xf3   :  { %1963 = vmatprep.subr.bf16.mxu1 %v2634_v9 }
 0x134   :  { %v912_v17 = vpop.f32.mrf.mxu0 }
 0x135   :  { %v953_v18 = vpop.f32.mrf.mxu1  ;;  %v913_v6 = vadd.f32 %v912_v17, %v207_v15  ;;  %v2629_v17 = vld [vmem:[#allocation8 + $0x108] ss:$16 sps:$4 sm:$0xff]  }
 0x136   :  { %v914_v19 = vpop.f32.mrf.mxu0 }
 0x137   :  { %v955_v7 = vpop.f32.mrf.mxu1  ;;  %v954_v20 = vadd.f32 %v953_v18, %v913_v6  ;;  %v915_v21 = vadd.f32 %v914_v19, %v211_v16 }
 0x138   :  { %v916_v22 = vpop.f32.mrf.mxu0 }
 0x139   :  { %v957_v23 = vpop.f32.mrf.mxu1  ;;  %v956_v24 = vadd.f32 %v955_v7, %v915_v21  ;;  %v1042_v25 = vmax.f32 %v954_v20, 0.0  ;;  %v2632_v20 = vld [vmem:[#allocation8 + $0x2e8] ss:$16 sps:$4 sm:$0xff]   ;;  %v2637_v22 = vld [vmem:[#allocation8 + $0x2cc] ss:$16 sps:$4 sm:$0xff]  }
 0x13a   :  { %v917_v26 = vpop.f32.mrf.mxu0  ;;  %v2635_v23 = vld [vmem:[#allocation8 + $0x2c8] ss:$16 sps:$4 sm:$0xff]  }
 0x13b   :  { %v958_v27 = vpop.f32.mrf.mxu1  ;;  %v1043_v28 = vmax.f32 %v956_v24, 0.0  ;;  %v2867_v31 = vpack.c.bf16 %v1042_v25, %v1042_v25  ;;  %v2640_v24 = vld [vmem:[#allocation8 + $0x2ac] ss:$16 sps:$4 sm:$0xff]   ;;  %v2638_v25 = vld [vmem:[#allocation8 + $0x2a8] ss:$16 sps:$4 sm:$0xff]  }
 0x13c   :  { %v2643_v26 = vld [vmem:[#allocation8 + $0x28c] ss:$16 sps:$4 sm:$0xff]   ;;  %v2641_v27 = vld [vmem:[#allocation8 + $0x288] ss:$16 sps:$4 sm:$0xff]  }
 0x13d   :  { %v1047_v29 = vpack.c.bf16 %v1043_v28, %v1043_v28  ;;  %v2646_v28 = vld [vmem:[#allocation8 + $0x26c] ss:$16 sps:$4 sm:$0xff]  }
 0x13f   :  { %1872 = vmatprep.mubr.bf16.mxu0 %v1047_v29 }
 0x140   :  { %1873 = vmatmul.mubr.bf16.vlgmr.msra.gmra.mxu0 %v2867_v31 }
 0x141   :  { %1923 = vmatpush1.bf16.msra.mxu0 %v2539_v30  ;;  %1954 = vmatprep.mubr.bf16.mxu0 %v1047_v29  ;;  %v2644_v29 = vld [vmem:[#allocation8 + $0x268] ss:$16 sps:$4 sm:$0xff]   ;;  %v2649_v30 = vld [vmem:[#allocation8 + $0x24c] ss:$16 sps:$4 sm:$0xff]  }
 0x142   :  { %1924 = vmatprep.subr.bf16.mxu0 %v2547_v32  ;;  %v2652_v32 = vld [vmem:[#allocation8 + $0x22c] ss:$16 sps:$4 sm:$0xff]  }
 0x145   :  { %1925 = vmatpush1.bf16.msra.mxu0 %v2545_v33  ;;  %v2650_v33 = vld [vmem:[#allocation8 + $0x228] ss:$16 sps:$4 sm:$0xff]  }
 0x146   :  { %1926 = vmatprep.subr.bf16.mxu0 %v2553_v34  ;;  %v2655_v34 = vld [vmem:[#allocation8 + $0x20c] ss:$16 sps:$4 sm:$0xff]  }
 0x149   :  { %1927 = vmatpush1.bf16.msra.mxu0 %v2551_v35  ;;  %v2653_v35 = vld [vmem:[#allocation8 + $0x208] ss:$16 sps:$4 sm:$0xff]  }
 0x14a   :  { %1928 = vmatprep.subr.bf16.mxu0 %v2559_v36  ;;  %v2658_v36 = vld [vmem:[#allocation8 + $0x3ec] ss:$16 sps:$4 sm:$0xff]  }
 0x14d   :  { %1929 = vmatpush1.bf16.msra.mxu0 %v2557_v37  ;;  %v2656_v37 = vld [vmem:[#allocation8 + $0x3e8] ss:$16 sps:$4 sm:$0xff]  }
 0x14e   :  { %1930 = vmatprep.subr.bf16.mxu0 %v2565_v38  ;;  %v2661_v38 = vld [vmem:[#allocation8 + $0x3cc] ss:$16 sps:$4 sm:$0xff]  }
 0x151   :  { %1931 = vmatpush1.bf16.msra.mxu0 %v2563_v39  ;;  %v2659_v39 = vld [vmem:[#allocation8 + $0x3c8] ss:$16 sps:$4 sm:$0xff]  }
 0x152   :  { %1932 = vmatprep.subr.bf16.mxu0 %v2571_v40  ;;  %v2664_v40 = vld [vmem:[#allocation8 + $0x3ac] ss:$16 sps:$4 sm:$0xff]  }
 0x155   :  { %1933 = vmatpush1.bf16.msra.mxu0 %v2569_v41  ;;  %v2662_v41 = vld [vmem:[#allocation8 + $0x3a8] ss:$16 sps:$4 sm:$0xff]  }
 0x156   :  { %1934 = vmatprep.subr.bf16.mxu0 %v2577_v42  ;;  %v2667_v42 = vld [vmem:[#allocation8 + $0x38c] ss:$16 sps:$4 sm:$0xff]  }
 0x159   :  { %1935 = vmatpush1.bf16.msra.mxu0 %v2575_v43  ;;  %v2665_v43 = vld [vmem:[#allocation8 + $0x388] ss:$16 sps:$4 sm:$0xff]  }
 0x15a   :  { %1936 = vmatprep.subr.bf16.mxu0 %v2583_v44  ;;  %v2670_v44 = vld [vmem:[#allocation8 + $0x36c] ss:$16 sps:$4 sm:$0xff]  }
 0x15d   :  { %1937 = vmatpush1.bf16.msra.mxu0 %v2581_v45  ;;  %v2668_v45 = vld [vmem:[#allocation8 + $0x368] ss:$16 sps:$4 sm:$0xff]  }
 0x15e   :  { %1938 = vmatprep.subr.bf16.mxu0 %v2589_v46  ;;  %v2673_v46 = vld [vmem:[#allocation8 + $0x34c] ss:$16 sps:$4 sm:$0xff]  }
 0x161   :  { %1939 = vmatpush2.bf16.msra.mxu0 %v2587_v47  ;;  %v2671_v47 = vld [vmem:[#allocation8 + $0x348] ss:$16 sps:$4 sm:$0xff]  }
 0x162   :  { %1940 = vmatprep.subr.bf16.mxu0 %v2595_v48  ;;  %v2676_v48 = vld [vmem:[#allocation8 + $0x32c] ss:$16 sps:$4 sm:$0xff]  }
 0x165   :  { %1941 = vmatpush2.bf16.msra.mxu0 %v2593_v49  ;;  %v2674_v49 = vld [vmem:[#allocation8 + $0x328] ss:$16 sps:$4 sm:$0xff]  }
 0x166   :  { %1942 = vmatprep.subr.bf16.mxu0 %v2601_v50  ;;  %v2679_v50 = vld [vmem:[#allocation8 + $0x30c] ss:$16 sps:$4 sm:$0xff]  }
 0x169   :  { %1943 = vmatpush2.bf16.msra.mxu0 %v2599_v51  ;;  %v2677_v51 = vld [vmem:[#allocation8 + $0x308] ss:$16 sps:$4 sm:$0xff]  }
 0x16a   :  { %1944 = vmatprep.subr.bf16.mxu0 %v2607_v52 }
 0x16d   :  { %1945 = vmatpush2.bf16.msra.mxu0 %v2605_v53 }
 0x16e   :  { %1946 = vmatprep.subr.bf16.mxu0 %v2613_v54 }
 0x171   :  { %1947 = vmatpush2.bf16.msra.mxu0 %v2611_v55 }
 0x172   :  { %1948 = vmatprep.subr.bf16.mxu0 %v2619_v57  ;;  %v1178_v57 = vld [vmem:[%s2901_s4] sm:$0xf]  ;;  %s2794_s4 = smov [#allocation10]  }
 0x173   :  { %s2014_s13 = sshll.u32 %s2794_s4, 4  ;;  %s2015_s13 = int_to_ptr.vmem [resolvable:$true] %s2014_s13 }
 0x174   :  { %v994_v63 = vpop.f32.mrf.mxu0  ;;  %s2760_s14 = scalar_lea.vmem %s2015_s13, 512  ;;  %p2765_p7 = scmp.lt.s32.totalorder %s2015_s13, %s2015_s13 }
 0x175   :  { %v1035_v0 = vpop.f32.mrf.mxu1  ;;  %v995_v1 = vadd.f32 %v994_v63, %v215_v60  ;;  %1949 = vmatpush2.bf16.msra.mxu0 %v2617_v59  ;;  %v1183_v59 = vrot.slane %v1178_v57, %v206_v12  ;;  %v1187_v60 = vrot.slane %v1178_v57, %v210_v14  ;;  %v1191_v12 = vrot.slane %v1178_v57, %v214_v56  ;;  %p2761_p6 = scmp.ne.s32.totalorder %s2015_s13, %s2760_s14  ;;  %p2766_p8 = scmp.lt.s32.totalorder %s2760_s14, %s2760_s14 }
 0x176   :  { %v996_v3 = vpop.f32.mrf.mxu0  ;;  %1950 = vmatprep.subr.bf16.mxu0 %v2625_v61  ;;  %v1195_v14 = vrot.slane %v1178_v57, %v218_v58 }
 0x177   :  { %v1037_v4 = vpop.f32.mrf.mxu1  ;;  %v1036_v8 = vadd.f32 %v1035_v0, %v995_v1  ;;  %v997_v9 = vadd.f32 %v996_v3, %v219_v62  ;;  %p2767_p9 = por %p2766_p8, %p2765_p7 }
 0x178   :  { %v998_v10 = vpop.f32.mrf.mxu0 }
 0x179   :  { %v1039_v15 = vpop.f32.mrf.mxu1  ;;  %v1038_v16 = vadd.f32 %v1037_v4, %v997_v9  ;;  %1951 = vmatpush2.bf16.msra.mxu0 %v2623_v2  ;;  %v1044_v18 = vmax.f32 %v1036_v8, 0.0  ;;  %p2768_p10 = pnand %p2767_p9, %p2761_p6 }
 0x17a   :  { %v999_v6 = vpop.f32.mrf.mxu0  ;;  %1952 = vmatprep.subr.bf16.mxu0 %v2631_v5 }
 0x17b   :  { %v1040_v19 = vpop.f32.mrf.mxu1  ;;  %v1045_v13 = vmax.f32 %v1038_v16, 0.0  ;;  %v2878_v21 = vpack.c.bf16 %v1044_v18, %v1044_v18 }
 0x17d   :  { %v1049_v7 = vpack.c.bf16 %v1045_v13, %v1045_v13  ;;  %1953 = vmatpush2.bf16.msra.mxu0 %v2629_v17 }
 0x17f   :  { %1913 = vmatprep.mubr.bf16.mxu1 %v1049_v7 }
 0x180   :  { %1955 = vmatmul.mubr.bf16.vlgmr.msra.gmra.mxu0 %v2867_v31  ;;  %1914 = vmatmul.mubr.bf16.vlgmr.msra.gmra.mxu1 %v2878_v21  ;;  %v2647_v31 = vld [vmem:[#allocation8 + $0x248] ss:$16 sps:$4 sm:$0xff]  }
 0x181   :  { %1964 = vmatpush1.bf16.msra.mxu1 %v2632_v20  ;;  %1995 = vmatprep.mubr.bf16.mxu1 %v1049_v7 }
 0x182   :  { %1965 = vmatprep.subr.bf16.mxu1 %v2637_v22 }
 0x185   :  { %1966 = vmatpush1.bf16.msra.mxu1 %v2635_v23 }
 0x186   :  { %1967 = vmatprep.subr.bf16.mxu1 %v2640_v24 }
 0x189   :  { %1968 = vmatpush1.bf16.msra.mxu1 %v2638_v25 }
 0x18a   :  { %1969 = vmatprep.subr.bf16.mxu1 %v2643_v26 }
 0x18d   :  { %1970 = vmatpush1.bf16.msra.mxu1 %v2641_v27 }
 0x18e   :  { %1971 = vmatprep.subr.bf16.mxu1 %v2646_v28 }
 0x191   :  { %1972 = vmatpush1.bf16.msra.mxu1 %v2644_v29 }
 0x192   :  { %1973 = vmatprep.subr.bf16.mxu1 %v2649_v30 }
 0x195   :  { %1974 = vmatpush1.bf16.msra.mxu1 %v2647_v31 }
 0x196   :  { %1975 = vmatprep.subr.bf16.mxu1 %v2652_v32 }
 0x199   :  { %1976 = vmatpush1.bf16.msra.mxu1 %v2650_v33 }
 0x19a   :  { %1977 = vmatprep.subr.bf16.mxu1 %v2655_v34 }
 0x19d   :  { %1978 = vmatpush1.bf16.msra.mxu1 %v2653_v35 }
 0x19e   :  { %1979 = vmatprep.subr.bf16.mxu1 %v2658_v36 }
 0x1a1   :  { %1980 = vmatpush2.bf16.msra.mxu1 %v2656_v37 }
 0x1a2   :  { %1981 = vmatprep.subr.bf16.mxu1 %v2661_v38 }
 0x1a5   :  { %1982 = vmatpush2.bf16.msra.mxu1 %v2659_v39 }
 0x1a6   :  { %1983 = vmatprep.subr.bf16.mxu1 %v2664_v40 }
 0x1a9   :  { %1984 = vmatpush2.bf16.msra.mxu1 %v2662_v41 }
 0x1aa   :  { %1985 = vmatprep.subr.bf16.mxu1 %v2667_v42 }
 0x1ad   :  { %1986 = vmatpush2.bf16.msra.mxu1 %v2665_v43 }
 0x1ae   :  { %1987 = vmatprep.subr.bf16.mxu1 %v2670_v44 }
 0x1b1   :  { %1988 = vmatpush2.bf16.msra.mxu1 %v2668_v45 }
 0x1b2   :  { %1989 = vmatprep.subr.bf16.mxu1 %v2673_v46 }
 0x1b5   :  { %1990 = vmatpush2.bf16.msra.mxu1 %v2671_v47 }
 0x1b6   :  { %1991 = vmatprep.subr.bf16.mxu1 %v2676_v48 }
 0x1b9   :  { %1992 = vmatpush2.bf16.msra.mxu1 %v2674_v49 }
 0x1ba   :  { %1993 = vmatprep.subr.bf16.mxu1 %v2679_v50 }
 0x1bd   :  { %1994 = vmatpush2.bf16.msra.mxu1 %v2677_v51 }
 0x1c0   :  { %1996 = vmatmul.mubr.bf16.vlgmr.msra.gmra.mxu1 %v2878_v21 }
 0x200   :  { %v1874_v52 = vpop.f32.mrf.mxu0 }
 0x201   :  { %v1875_v61 = vadd.f32 %v1874_v52, %v1183_v59 }
 0x202   :  { %v1876_v53 = vpop.f32.mrf.mxu0 }
 0x203   :  { %v1877_v0 = vadd.f32 %v1876_v53, %v1187_v60 }
 0x204   :  { %v1878_v54 = vpop.f32.mrf.mxu0 }
 0x206   :  { %v1879_v55 = vpop.f32.mrf.mxu0 }
 0x240   :  { %v1956_v62 = vpop.f32.mrf.mxu0  ;;  %v1915_v63 = vpop.f32.mrf.mxu1 }
 0x241   :  { %v1916_v1 = vadd.f32 %v1915_v63, %v1875_v61  ;;  %v1957_v15 = vadd.f32 %v1956_v62, %v1191_v12 }
 0x242   :  { %v1958_v2 = vpop.f32.mrf.mxu0  ;;  %v1917_v3 = vpop.f32.mrf.mxu1 }
 0x243   :  { %2004 = vst [vmem:[#allocation10] sm:$0xff] %v1916_v1  ;;  %v1918_v4 = vadd.f32 %v1917_v3, %v1877_v0  ;;  %v1959_v17 = vadd.f32 %v1958_v2, %v1195_v14 }
 0x244   :  { %v1960_v5 = vpop.f32.mrf.mxu0  ;;  %v1919_v8 = vpop.f32.mrf.mxu1 }
 0x245   :  { %2005 = vst [vmem:[#allocation10 + $0x8] sm:$0xff] %v1918_v4 }
 0x246   :  { %v1961_v9 = vpop.f32.mrf.mxu0  ;;  %v1920_v10 = vpop.f32.mrf.mxu1 }
 0x280   :  { %v1997_v16 = vpop.f32.mrf.mxu1 }
 0x281   :  { %v1998_v18 = vadd.f32 %v1997_v16, %v1957_v15 }
 0x282   :  { %v1999_v6 = vpop.f32.mrf.mxu1 }
 0x283   :  { %2006 = vst [vmem:[#allocation10 + $0x10] sm:$0xff] %v1998_v18  ;;  %v2000_v19 = vadd.f32 %v1999_v6, %v1959_v17 }
 0x284   :  { %v2001_v13 = vpop.f32.mrf.mxu1 }
 0x285   :  { %2007 = vst [vmem:[#allocation10 + $0x18] sm:$0xff] %v2000_v19 }
 0x286   :  { %v2002_v7 = vpop.f32.mrf.mxu1 }
 0x287   :  { %2771 = shalt.err (!%p2768_p10)
}
 0x288   :  { %2017 = dma.vmem_to_hbm [thread:$0]  %s2015_s13, 512, %s2902_s5, [#allocation4]  }
 0x289   :  { %2786 = dma.done.wait [#allocation4], 512  }
 0x28a   :  { %2787 = vsyncadd [#allocation4], 4294966784 }
 0x28b   :  { %2021 = vsyncpa [#allocation3], 1 }
 0x28c   :  { %2022 = vsyncpa [#allocation6], 1 }
 0x28d   :  { %2023 = vsyncpa [#allocation9], 1 }
 0x28e   :  { %2024 = vsyncpa [#allocation4], 1 }

</bundles_post_ra>
